<compile_context>
chip_gen: v7x
topology: tpu7x:2x2x1
jax: 0.10.0
libtpu: 0.0.40
codegen_flags: <defaults>
</compile_context>

<pallas_src>
import jax
import jax.numpy as jnp
from jax.experimental import pallas as pl
from jax.experimental.pallas import tpu as pltpu

_MIN_BYTES_PER_CHUNK = 1 << 20   # below ~1 MiB, extra in-flight DMAs are pure overhead
_MAX_CHUNKS = 4                  # DMAs kept in flight for large arrays


def _choose_chunks(d0, nbytes):
    """Static (start, stop) ranges along axis 0; roughly equal, >=1 chunk."""
    n = min(d0, _MAX_CHUNKS, max(1, nbytes // _MIN_BYTES_PER_CHUNK))
    n = max(1, int(n))
    base, rem = divmod(d0, n)
    bounds, start = [], 0
    for i in range(n):
        stop = start + base + (1 if i < rem else 0)
        if stop > start:
            bounds.append((start, stop))
        start = stop
    return tuple(bounds)


def _make_dma_copy_kernel(chunk_bounds, d0):
    """Kernel: pure HBM->HBM DMA copy, all chunk DMAs in flight before waiting."""

    def kernel(x_hbm, o_hbm, sem):
        copies = []
        for idx, (lo, hi) in enumerate(chunk_bounds):
            if lo == 0 and hi == d0:
                src, dst = x_hbm, o_hbm          # whole-array copy, no slicing
            else:
                src, dst = x_hbm.at[lo:hi], o_hbm.at[lo:hi]   # static slice = free view
            cp = pltpu.make_async_copy(src, dst, sem.at[idx])
            cp.start()
            copies.append(cp)
        for cp in copies:
            cp.wait()

    return kernel


@jax.jit
def pallas_identity(x):
    """Identity via a direct HBM->HBM DMA copy inside a Pallas TPU kernel."""
    if x.size == 0:
        return x

    orig_shape = x.shape
    # Give the kernel at least one leading axis to (optionally) chunk along.
    xw = x.reshape(1) if x.ndim == 0 else x

    nbytes = xw.size * jnp.dtype(xw.dtype).itemsize
    d0 = xw.shape[0]
    chunks = _choose_chunks(d0, nbytes)

    out = pl.pallas_call(
        _make_dma_copy_kernel(chunks, d0),
        out_shape=jax.ShapeDtypeStruct(xw.shape, xw.dtype),
        in_specs=[pl.BlockSpec(memory_space=pl.ANY)],
        out_specs=pl.BlockSpec(memory_space=pl.ANY),
        scratch_shapes=[pltpu.SemaphoreType.DMA((len(chunks),))],
        cost_estimate=pl.CostEstimate(
            flops=0, transcendentals=0, bytes_accessed=2 * nbytes),
    )(xw)

    return out.reshape(orig_shape)


if __name__ == "__main__":
    key = jax.random.PRNGKey(0)
    # Small example input consistent with a generic NCHW tensor.
    x = jax.random.normal(key, (2, 4, 16, 16), dtype=jnp.float32)

    y = pallas_identity(x)
    jax.block_until_ready(y)

    assert y.shape == x.shape and y.dtype == x.dtype
    assert bool(jnp.all(y == x))
    print("KERNEL_OK")
</pallas_src>

<mosaic_0001>
module attributes {stable_mosaic.version = 11 : i64} {
  func.func @kernel(%arg0: memref<2x4x16x16xf32, #tpu.memory_space<any>>, %arg1: memref<2x4x16x16xf32, #tpu.memory_space<any>>, %arg2: memref<1x!tpu.dma_semaphore, #tpu.memory_space<semaphore_mem>>) attributes {dimension_semantics = [], scalar_prefetch = 0 : i64, scratch_operands = 1 : i64, tpu.core_type = #tpu.core_type<tc>} {
    %c0_i32 = arith.constant 0 : i32
    %0 = tpu.memref_slice %arg2[%c0_i32] : memref<1x!tpu.dma_semaphore, #tpu.memory_space<semaphore_mem>> -> memref<1x!tpu.dma_semaphore, #tpu.memory_space<semaphore_mem>>
    %1 = tpu.memref_squeeze %0 : memref<1x!tpu.dma_semaphore, #tpu.memory_space<semaphore_mem>> -> memref<!tpu.dma_semaphore, #tpu.memory_space<semaphore_mem>>
    tpu.enqueue_dma source(%arg0 : memref<2x4x16x16xf32, #tpu.memory_space<any>>) target(%arg1 : memref<2x4x16x16xf32, #tpu.memory_space<any>>) target_semaphore(%1 : memref<!tpu.dma_semaphore, #tpu.memory_space<semaphore_mem>>)
    %c0_i32_0 = arith.constant 0 : i32
    %2 = tpu.memref_slice %arg2[%c0_i32_0] : memref<1x!tpu.dma_semaphore, #tpu.memory_space<semaphore_mem>> -> memref<1x!tpu.dma_semaphore, #tpu.memory_space<semaphore_mem>>
    %3 = tpu.memref_squeeze %2 : memref<1x!tpu.dma_semaphore, #tpu.memory_space<semaphore_mem>> -> memref<!tpu.dma_semaphore, #tpu.memory_space<semaphore_mem>>
    tpu.wait_dma2 semaphore(%3 : memref<!tpu.dma_semaphore, #tpu.memory_space<semaphore_mem>>) src(%arg0 : memref<2x4x16x16xf32, #tpu.memory_space<any>>) dst(%arg1 : memref<2x4x16x16xf32, #tpu.memory_space<any>>)
    return
  }
}

</mosaic_0001>

<bundles_post_ra>
// kernel: pallas_identity.1
= control target key start
LH: loop header
LB: loop body
LE: loop exit
PB: predicated region body
PF: predicated region fallthrough
CT: control target
= control target key end

     0   :  { %s36_s6 = smov [#allocation2]   ;;  %s37_s7 = smov [#allocation3]   ;;  %s55_s0 = inlined_call_operand.hbm [shape: f32[2,4,16,16], index: 0, kind: input, shape index: {}]   ;;  %s56_s1 = inlined_call_operand.hbm [shape: f32[2,4,16,16], index: 1, kind: output, shape index: {}]  }
   0x1   :  { %s38_s8 = smov 0  }
   0x2   :  { %18 = dma.general %s55_s0, 2048, %s56_s1, %s36_s6, %s37_s7, [#allocation4], %s38_s8, 0  }
   0x3   :  { %34 = dma.done.wait [#allocation2], 2048 }
   0x4   :  { %35 = vsyncadd [#allocation2], 4294965248 }
   0x5   :  { %24 = vsyncmov [#allocation2] }
   0x8   :  { %s25_s13 = vpop.sfrf %24 }
   0x9   :  { %p30_p0 = scmp.ne.s32.totalorder %s25_s13, 0 }
   0xb   :  { %29 = shalt.err (%p30_p0)  }

</bundles_post_ra>
